<compile_context>
chip_gen: v7x
topology: tpu7x:2x2x1
jax: 0.10.0
libtpu: 0.0.40
codegen_flags: <defaults>
</compile_context>

<pallas_src>
import functools
import math

import jax
import jax.numpy as jnp
from jax.experimental import pallas as pl
from jax.experimental.pallas import tpu as pltpu


def _round_up(v: int, m: int) -> int:
    return (v + m - 1) // m * m


def _cdiv(a: int, b: int) -> int:
    return -(-a // b)


def _vmem_capacity_bytes() -> int:
    try:
        return int(pltpu.get_tpu_info().vmem_capacity_bytes)
    except Exception:
        return 64 * 1024 * 1024  # conservative fallback (v7x per-TC VMEM)


def _indicator_kernel(x_ref, xg_ref, w1a_ref, w1b_ref, b1_ref,
                      w2t_ref, w2a_ref, w2b_ref, b2_ref,
                      o_ref, xw1_sc, xw2_sc, *, precision):
    """One (tile_m rows) x (one support item k) step of the fused MLP.

    y = relu( relu(x@W1a^T + xg@W1b^T + b1) @ W2^T  +  x@W2a^T + xg@W2b^T + b2 )
    which is exactly relu(fc2(relu(fc1(xc)) + xc)) with xc = cat([x, xg]).
    """
    k = pl.program_id(1)

    # x-half of both layers is independent of k: compute once per row tile.
    @pl.when(k == 0)
    def _():
        x = x_ref[...]
        xw1_sc[...] = jnp.dot(x, w1a_ref[...],
                              preferred_element_type=jnp.float32,
                              precision=precision) + b1_ref[...]
        xw2_sc[...] = jnp.dot(x, w2a_ref[...],
                              preferred_element_type=jnp.float32,
                              precision=precision) + b2_ref[...]

    xg = xg_ref[...]
    s1 = xw1_sc[...] + jnp.dot(xg, w1b_ref[...],
                               preferred_element_type=jnp.float32,
                               precision=precision)
    h = jnp.maximum(s1, 0.0)                                   # relu(fc1(xc))
    s2 = (jnp.dot(h.astype(w2t_ref.dtype), w2t_ref[...],
                  preferred_element_type=jnp.float32, precision=precision)
          + xw2_sc[...]
          + jnp.dot(xg, w2b_ref[...],
                    preferred_element_type=jnp.float32, precision=precision))
    o_ref[...] = jnp.maximum(s2, 0.0).astype(o_ref.dtype)       # relu(fc2(h+xc))


def prepare_indicator_params(w1, b1, w2, b2, dx, *, compute_dtype=None):
    """Transpose + split torch-layout Linear params once, outside the hot path.

    w1: (D_in, D_in), b1: (D_in,)  -- fc1
    w2: (D_out, D_in), b2: (D_out,) -- fc2
    dx: feature width of `x` (so dg = D_in - dx is the width of `x_gen`).
    """
    w1 = jnp.asarray(w1); b1 = jnp.asarray(b1)
    w2 = jnp.asarray(w2); b2 = jnp.asarray(b2)
    d_in = int(w1.shape[1]); d_out = int(w2.shape[0])
    dg = d_in - dx
    assert 0 < dx < d_in, (dx, d_in)
    dt = jnp.dtype(compute_dtype) if compute_dtype is not None else w1.dtype

    w1t = w1.T.astype(dt)            # (D_in, D_in)
    w2t = w2.T.astype(dt)            # (D_in, D_out)
    return {
        "w1a_t": w1t[:dx],           # (dx, D_in)
        "w1b_t": w1t[dx:],           # (dg, D_in)
        "w2t":   w2t,                # (D_in, D_out)
        "w2a_t": w2t[:dx],           # (dx, D_out)
        "w2b_t": w2t[dx:],           # (dg, D_out)
        "b1": b1.astype(jnp.float32).reshape(1, d_in),
        "b2": b2.astype(jnp.float32).reshape(1, d_out),
        "dx": dx, "dg": dg, "d_in": d_in, "d_out": d_out,
    }


def _indicator_mlp_pallas(x2, xg3, params, *, tile_rows=None, precision=None):
    """x2: (n, dx); xg3: (K, n, dg); returns (K, n, d_out)."""
    dx, dg = params["dx"], params["dg"]
    d_in, d_out = params["d_in"], params["d_out"]
    n = int(x2.shape[0])
    K = int(xg3.shape[0])
    assert x2.shape == (n, dx) and xg3.shape == (K, n, dg)

    out_dtype = x2.dtype
    out_isz = jnp.dtype(out_dtype).itemsize
    if precision is None and jnp.dtype(out_dtype) == jnp.float32:
        precision = jax.lax.Precision.HIGHEST   # match torch float32 Linear

    w1a, w1b, b1 = params["w1a_t"], params["w1b_t"], params["b1"]
    w2t, w2a, w2b, b2 = params["w2t"], params["w2a_t"], params["w2b_t"], params["b2"]
    weights = (w1a, w1b, b1, w2t, w2a, w2b, b2)
    weight_bytes = sum(int(w.size) * w.dtype.itemsize for w in weights)

    # --- tile sizing from the chip's VMEM budget ------------------------------
    vmem_cap = _vmem_capacity_bytes()
    if tile_rows is None:
        tile_rows = 2048 if vmem_cap >= (96 << 20) else 1024   # bigger tiles on 128 MiB chips

    per_row_bytes = (
        2 * dx * x2.dtype.itemsize          # x, double-buffered
        + 2 * dg * xg3.dtype.itemsize       # x_gen, double-buffered
        + 2 * d_out * out_isz               # out, double-buffered
        + (d_in + d_out) * 4                # f32 scratch (cached x-half)
        + (2 * d_in + d_out) * 4)           # f32 intermediates headroom
    budget = vmem_cap - (16 << 20)
    max_tile = max((budget - weight_bytes) // per_row_bytes, 8)
    max_tile = max((max_tile // 8) * 8, 8)
    tile_rows_eff = max(min((int(tile_rows) // 8) * 8, max_tile), 8)

    num_tiles = _cdiv(n, tile_rows_eff)
    if n > 64:
        num_tiles = max(num_tiles, 2)       # >=2 row tiles so both v7x TCs get work
    tile_m = _round_up(_cdiv(n, num_tiles), 8)
    grid_rows = _cdiv(n, tile_m)            # partial last block is masked by Pallas

    vmem_need = weight_bytes + tile_m * per_row_bytes + (2 << 20)
    vmem_limit = int(min(max(vmem_need, 16 << 20), vmem_cap - (8 << 20)))

    # --- advisory cost (true, unpadded dims) ---------------------------------
    flops = (2 * n * dx * (d_in + d_out)
             + 2 * n * K * (dg * d_in + d_in * d_out + dg * d_out))
    bytes_accessed = (n * dx * x2.dtype.itemsize
                      + K * n * dg * xg3.dtype.itemsize
                      + weight_bytes
                      + K * n * d_out * out_isz)

    kernel = functools.partial(_indicator_kernel, precision=precision)

    out = pl.pallas_call(
        kernel,
        out_shape=jax.ShapeDtypeStruct((K, n, d_out), out_dtype),
        grid=(grid_rows, K),
        in_specs=[
            pl.BlockSpec((tile_m, dx), lambda i, k: (i, 0)),           # x rows (reused across K)
            pl.BlockSpec((None, tile_m, dg), lambda i, k: (k, i, 0)),  # x_gen rows (streamed)
            pl.BlockSpec((dx, d_in), lambda i, k: (0, 0)),             # W1a^T  (resident)
            pl.BlockSpec((dg, d_in), lambda i, k: (0, 0)),             # W1b^T  (resident)
            pl.BlockSpec((1, d_in), lambda i, k: (0, 0)),              # b1     (resident)
            pl.BlockSpec((d_in, d_out), lambda i, k: (0, 0)),          # W2^T   (resident)
            pl.BlockSpec((dx, d_out), lambda i, k: (0, 0)),            # W2a^T  (resident)
            pl.BlockSpec((dg, d_out), lambda i, k: (0, 0)),            # W2b^T  (resident)
            pl.BlockSpec((1, d_out), lambda i, k: (0, 0)),             # b2     (resident)
        ],
        out_specs=pl.BlockSpec((None, tile_m, d_out), lambda i, k: (k, i, 0)),
        scratch_shapes=[pltpu.VMEM((tile_m, d_in), jnp.float32),       # x@W1a^T + b1
                        pltpu.VMEM((tile_m, d_out), jnp.float32)],     # x@W2a^T + b2
        compiler_params=pltpu.CompilerParams(
            dimension_semantics=("parallel", "arbitrary"),
            vmem_limit_bytes=vmem_limit),
        cost_estimate=pl.CostEstimate(
            flops=flops, transcendentals=0, bytes_accessed=bytes_accessed),
    )(x2, xg3, w1a, w1b, b1, w2t, w2a, w2b, b2)
    return out


def indicator_layer_forward(x, x_gen, level, params, *, tile_rows=None, precision=None):
    """Mirrors indicator_layer.forward(x, x_gen, level)."""
    dx, dg, d_out = params["dx"], params["dg"], params["d_out"]
    if level == "sample":
        assert x.shape[:-1] == x_gen.shape[:-1]
        assert x.shape[-1] == dx and x_gen.shape[-1] == dg
        lead = x.shape[:-1]
        n = int(math.prod(lead)) if lead else 1
        out = _indicator_mlp_pallas(x.reshape(n, dx), x_gen.reshape(1, n, dg),
                                    params, tile_rows=tile_rows, precision=precision)
        return out.reshape(*lead, d_out)
    elif level == "support":
        # torch: `for item in x_gen: ...; stack`  == an extra grid axis over K.
        K = x_gen.shape[0]
        assert x_gen.shape[1:-1] == x.shape[:-1]
        assert x.shape[-1] == dx and x_gen.shape[-1] == dg
        lead = x.shape[:-1]
        n = int(math.prod(lead)) if lead else 1
        out = _indicator_mlp_pallas(x.reshape(n, dx), x_gen.reshape(K, n, dg),
                                    params, tile_rows=tile_rows, precision=precision)
        return out.reshape(K, *lead, d_out)
    raise ValueError(f"unknown level: {level!r}")


if __name__ == "__main__":
    key = jax.random.PRNGKey(0)
    kx, kg, kgs, kw1, kb1, kw2, kb2, kx2, kg2 = jax.random.split(key, 9)

    B, S = 2, 8
    DX, DG = 16, 16
    D_IN = DX + DG          # indicator_layer input_dimension (after concat)
    D_OUT = 16              # output_dimension
    K = 3                   # number of 'support' items

    x = jax.random.normal(kx, (B, S, DX), dtype=jnp.float32)
    x_gen = jax.random.normal(kg, (B, S, DG), dtype=jnp.float32)
    x_gen_sup = jax.random.normal(kgs, (K, B, S, DG), dtype=jnp.float32)

    # torch nn.Linear parameter layout: weight (out, in), bias (out,)
    w1 = jax.random.normal(kw1, (D_IN, D_IN), dtype=jnp.float32) / math.sqrt(D_IN)
    b1 = jax.random.normal(kb1, (D_IN,), dtype=jnp.float32) * 0.1
    w2 = jax.random.normal(kw2, (D_OUT, D_IN), dtype=jnp.float32) / math.sqrt(D_IN)
    b2 = jax.random.normal(kb2, (D_OUT,), dtype=jnp.float32) * 0.1

    params = prepare_indicator_params(w1, b1, w2, b2, dx=DX)

    def _reference(xv, xgv):
        xc = jnp.concatenate([xv, xgv], axis=-1)
        hp = jax.lax.Precision.HIGHEST
        h = jnp.maximum(jnp.dot(xc, w1.T, precision=hp) + b1, 0.0) + xc
        return jnp.maximum(jnp.dot(h, w2.T, precision=hp) + b2, 0.0)

    # level == 'sample'
    out_s = jax.block_until_ready(indicator_layer_forward(x, x_gen, "sample", params))
    ref_s = _reference(x, x_gen)
    assert out_s.shape == (B, S, D_OUT)
    assert jnp.allclose(out_s, ref_s, atol=1e-4, rtol=1e-4), \
        float(jnp.max(jnp.abs(out_s - ref_s)))

    # level == 'support'
    out_p = jax.block_until_ready(indicator_layer_forward(x, x_gen_sup, "support", params))
    ref_p = jnp.stack([_reference(x, x_gen_sup[k]) for k in range(K)])
    assert out_p.shape == (K, B, S, D_OUT)
    assert jnp.allclose(out_p, ref_p, atol=1e-4, rtol=1e-4), \
        float(jnp.max(jnp.abs(out_p - ref_p)))

    # boundary check: n not a multiple of the row tile -> masked partial last block
    Bb, Sb = 2, 37          # n = 74 rows > 64 -> 2 row tiles, last one partial
    xb = jax.random.normal(kx2, (Bb, Sb, DX), dtype=jnp.float32)
    xgb = jax.random.normal(kg2, (Bb, Sb, DG), dtype=jnp.float32)
    out_b = jax.block_until_ready(indicator_layer_forward(xb, xgb, "sample", params))
    ref_b = _reference(xb, xgb)
    assert out_b.shape == (Bb, Sb, D_OUT)
    assert jnp.allclose(out_b, ref_b, atol=1e-4, rtol=1e-4), \
        float(jnp.max(jnp.abs(out_b - ref_b)))

    print("KERNEL_OK")
</pallas_src>

<mosaic_0001>
module attributes {stable_mosaic.version = 11 : i64} {
  func.func @_indicator_kernel(%arg0: i32, %arg1: i32, %arg2: memref<16x16xf32, #tpu.memory_space<vmem>>, %arg3: memref<1x16x16xf32, #tpu.memory_space<vmem>>, %arg4: memref<16x32xf32, #tpu.memory_space<vmem>>, %arg5: memref<16x32xf32, #tpu.memory_space<vmem>>, %arg6: memref<1x32xf32, #tpu.memory_space<vmem>>, %arg7: memref<32x16xf32, #tpu.memory_space<vmem>>, %arg8: memref<16x16xf32, #tpu.memory_space<vmem>>, %arg9: memref<16x16xf32, #tpu.memory_space<vmem>>, %arg10: memref<1x16xf32, #tpu.memory_space<vmem>>, %arg11: memref<1x16x16xf32, #tpu.memory_space<vmem>>, %arg12: memref<16x32xf32, #tpu.memory_space<vmem>>, %arg13: memref<16x16xf32, #tpu.memory_space<vmem>>) attributes {dimension_semantics = [#tpu.dimension_semantics<parallel>, #tpu.dimension_semantics<arbitrary>], iteration_bounds = array<i64: 1, 1>, scalar_prefetch = 0 : i64, scratch_operands = 2 : i64, tpu.core_type = #tpu.core_type<tc>, window_params = [{transform_indices = @transform_0, window_bounds = array<i64: 16, 16>}, {transform_indices = @transform_1, window_bounds = array<i64: 1, 16, 16>}, {pipeline_mode = #tpu.pipeline_mode<synchronous>, transform_indices = @transform_2, window_bounds = array<i64: 16, 32>}, {pipeline_mode = #tpu.pipeline_mode<synchronous>, transform_indices = @transform_3, window_bounds = array<i64: 16, 32>}, {pipeline_mode = #tpu.pipeline_mode<synchronous>, transform_indices = @transform_4, window_bounds = array<i64: 1, 32>}, {pipeline_mode = #tpu.pipeline_mode<synchronous>, transform_indices = @transform_5, window_bounds = array<i64: 32, 16>}, {pipeline_mode = #tpu.pipeline_mode<synchronous>, transform_indices = @transform_6, window_bounds = array<i64: 16, 16>}, {pipeline_mode = #tpu.pipeline_mode<synchronous>, transform_indices = @transform_7, window_bounds = array<i64: 16, 16>}, {pipeline_mode = #tpu.pipeline_mode<synchronous>, transform_indices = @transform_8, window_bounds = array<i64: 1, 16>}, {transform_indices = @transform_9, window_bounds = array<i64: 1, 16, 16>}]} {
    %c0_i32 = arith.constant 0 : i32
    %0 = arith.cmpi eq, %arg1, %c0_i32 : i32
    %1 = arith.extui %0 : i1 to i32
    %c0_i32_0 = arith.constant 0 : i32
    %2 = arith.cmpi ne, %1, %c0_i32_0 : i32
    scf.if %2 {
      %c0_20 = arith.constant 0 : index
      %c0_21 = arith.constant 0 : index
      %23 = vector.load %arg2[%c0_20, %c0_21] : memref<16x16xf32, #tpu.memory_space<vmem>>, vector<16x16xf32>
      %c0_22 = arith.constant 0 : index
      %c0_23 = arith.constant 0 : index
      %24 = vector.load %arg4[%c0_22, %c0_23] : memref<16x32xf32, #tpu.memory_space<vmem>>, vector<16x32xf32>
      %cst_24 = arith.constant dense<0.000000e+00> : vector<16x32xf32>
      %25 = tpu.matmul %23, %24, %cst_24 {dimension_numbers = #tpu.dot_dimension_numbers<[1], [0], [0], [1], [0, 0, 1, 1], [], []>, precision = #tpu.contract_precision<fp32>} : vector<16x16xf32>, vector<16x32xf32>, vector<16x32xf32> -> vector<16x32xf32>
      %c0_25 = arith.constant 0 : index
      %c0_26 = arith.constant 0 : index
      %26 = vector.load %arg6[%c0_25, %c0_26] : memref<1x32xf32, #tpu.memory_space<vmem>>, vector<1x32xf32>
      %27 = vector.broadcast %26 : vector<1x32xf32> to vector<16x32xf32>
      %28 = arith.addf %25, %27 : vector<16x32xf32>
      %c0_27 = arith.constant 0 : index
      %c0_28 = arith.constant 0 : index
      %29 = vector.load %arg12[%c0_27, %c0_28] : memref<16x32xf32, #tpu.memory_space<vmem>>, vector<16x32xf32>
      tpu.vector_store %arg12[%c0_27, %c0_28], %28 {strides = array<i32>} : memref<16x32xf32, #tpu.memory_space<vmem>>, vector<16x32xf32>,
      %c0_29 = arith.constant 0 : index
      %c0_30 = arith.constant 0 : index
      %30 = vector.load %arg8[%c0_29, %c0_30] : memref<16x16xf32, #tpu.memory_space<vmem>>, vector<16x16xf32>
      %cst_31 = arith.constant dense<0.000000e+00> : vector<16x16xf32>
      %31 = tpu.matmul %23, %30, %cst_31 {dimension_numbers = #tpu.dot_dimension_numbers<[1], [0], [0], [1], [0, 0, 1, 1], [], []>, precision = #tpu.contract_precision<fp32>} : vector<16x16xf32>, vector<16x16xf32>, vector<16x16xf32> -> vector<16x16xf32>
      %c0_32 = arith.constant 0 : index
      %c0_33 = arith.constant 0 : index
      %32 = vector.load %arg10[%c0_32, %c0_33] : memref<1x16xf32, #tpu.memory_space<vmem>>, vector<1x16xf32>
      %33 = vector.broadcast %32 : vector<1x16xf32> to vector<16x16xf32>
      %34 = arith.addf %31, %33 : vector<16x16xf32>
      %c0_34 = arith.constant 0 : index
      %c0_35 = arith.constant 0 : index
      %35 = vector.load %arg13[%c0_34, %c0_35] : memref<16x16xf32, #tpu.memory_space<vmem>>, vector<16x16xf32>
      tpu.vector_store %arg13[%c0_34, %c0_35], %34 {strides = array<i32>} : memref<16x16xf32, #tpu.memory_space<vmem>>, vector<16x16xf32>,
    } else {
    }
    %c0 = arith.constant 0 : index
    %c0_1 = arith.constant 0 : index
    %c0_2 = arith.constant 0 : index
    %3 = vector.load %arg3[%c0, %c0_1, %c0_2] : memref<1x16x16xf32, #tpu.memory_space<vmem>>, vector<1x16x16xf32>
    %4 = vector.shape_cast %3 : vector<1x16x16xf32> to vector<16x16xf32>
    %c0_3 = arith.constant 0 : index
    %c0_4 = arith.constant 0 : index
    %5 = vector.load %arg12[%c0_3, %c0_4] : memref<16x32xf32, #tpu.memory_space<vmem>>, vector<16x32xf32>
    %c0_5 = arith.constant 0 : index
    %c0_6 = arith.constant 0 : index
    %6 = vector.load %arg5[%c0_5, %c0_6] : memref<16x32xf32, #tpu.memory_space<vmem>>, vector<16x32xf32>
    %cst = arith.constant dense<0.000000e+00> : vector<16x32xf32>
    %7 = tpu.matmul %4, %6, %cst {dimension_numbers = #tpu.dot_dimension_numbers<[1], [0], [0], [1], [0, 0, 1, 1], [], []>, precision = #tpu.contract_precision<fp32>} : vector<16x16xf32>, vector<16x32xf32>, vector<16x32xf32> -> vector<16x32xf32>
    %8 = arith.addf %5, %7 : vector<16x32xf32>
    %cst_7 = arith.constant 0.000000e+00 : f32
    %9 = vector.broadcast %cst_7 : f32 to vector<16x32xf32>
    %10 = arith.maximumf %8, %9 : vector<16x32xf32>
    %c0_8 = arith.constant 0 : index
    %c0_9 = arith.constant 0 : index
    %11 = vector.load %arg7[%c0_8, %c0_9] : memref<32x16xf32, #tpu.memory_space<vmem>>, vector<32x16xf32>
    %cst_10 = arith.constant dense<0.000000e+00> : vector<16x16xf32>
    %12 = tpu.matmul %10, %11, %cst_10 {dimension_numbers = #tpu.dot_dimension_numbers<[1], [0], [0], [1], [0, 0, 1, 1], [], []>, precision = #tpu.contract_precision<fp32>} : vector<16x32xf32>, vector<32x16xf32>, vector<16x16xf32> -> vector<16x16xf32>
    %c0_11 = arith.constant 0 : index
    %c0_12 = arith.constant 0 : index
    %13 = vector.load %arg13[%c0_11, %c0_12] : memref<16x16xf32, #tpu.memory_space<vmem>>, vector<16x16xf32>
    %14 = arith.addf %12, %13 : vector<16x16xf32>
    %c0_13 = arith.constant 0 : index
    %c0_14 = arith.constant 0 : index
    %15 = vector.load %arg9[%c0_13, %c0_14] : memref<16x16xf32, #tpu.memory_space<vmem>>, vector<16x16xf32>
    %cst_15 = arith.constant dense<0.000000e+00> : vector<16x16xf32>
    %16 = tpu.matmul %4, %15, %cst_15 {dimension_numbers = #tpu.dot_dimension_numbers<[1], [0], [0], [1], [0, 0, 1, 1], [], []>, precision = #tpu.contract_precision<fp32>} : vector<16x16xf32>, vector<16x16xf32>, vector<16x16xf32> -> vector<16x16xf32>
    %17 = arith.addf %14, %16 : vector<16x16xf32>
    %cst_16 = arith.constant 0.000000e+00 : f32
    %18 = vector.broadcast %cst_16 : f32 to vector<16x16xf32>
    %19 = arith.maximumf %17, %18 : vector<16x16xf32>
    %c0_17 = arith.constant 0 : index
    %c0_18 = arith.constant 0 : index
    %c0_19 = arith.constant 0 : index
    %20 = vector.load %arg11[%c0_17, %c0_18, %c0_19] : memref<1x16x16xf32, #tpu.memory_space<vmem>>, vector<1x16x16xf32>
    %21 = vector.shape_cast %20 : vector<1x16x16xf32> to vector<16x16xf32>
    %22 = vector.shape_cast %19 : vector<16x16xf32> to vector<1x16x16xf32>
    tpu.vector_store %arg11[%c0_17, %c0_18, %c0_19], %22 {strides = array<i32>} : memref<1x16x16xf32, #tpu.memory_space<vmem>>, vector<1x16x16xf32>,
    return
  }
  func.func @transform_0(%arg0: i32, %arg1: i32) -> (i32, i32) {
    %c0_i32 = arith.constant 0 : i32
    %c0_i32_0 = arith.constant 0 : i32
    return %arg0, %c0_i32 : i32, i32
  }
  func.func @transform_1(%arg0: i32, %arg1: i32) -> (i32, i32, i32) {
    %c0_i32 = arith.constant 0 : i32
    %c0_i32_0 = arith.constant 0 : i32
    return %arg1, %arg0, %c0_i32 : i32, i32, i32
  }
  func.func @transform_2(%arg0: i32, %arg1: i32) -> (i32, i32) {
    %c0_i32 = arith.constant 0 : i32
    %c0_i32_0 = arith.constant 0 : i32
    %c0_i32_1 = arith.constant 0 : i32
    return %c0_i32, %c0_i32_0 : i32, i32
  }
  func.func @transform_3(%arg0: i32, %arg1: i32) -> (i32, i32) {
    %c0_i32 = arith.constant 0 : i32
    %c0_i32_0 = arith.constant 0 : i32
    %c0_i32_1 = arith.constant 0 : i32
    return %c0_i32, %c0_i32_0 : i32, i32
  }
  func.func @transform_4(%arg0: i32, %arg1: i32) -> (i32, i32) {
    %c0_i32 = arith.constant 0 : i32
    %c0_i32_0 = arith.constant 0 : i32
    %c0_i32_1 = arith.constant 0 : i32
    return %c0_i32, %c0_i32_0 : i32, i32
  }
  func.func @transform_5(%arg0: i32, %arg1: i32) -> (i32, i32) {
    %c0_i32 = arith.constant 0 : i32
    %c0_i32_0 = arith.constant 0 : i32
    %c0_i32_1 = arith.constant 0 : i32
    return %c0_i32, %c0_i32_0 : i32, i32
  }
  func.func @transform_6(%arg0: i32, %arg1: i32) -> (i32, i32) {
    %c0_i32 = arith.constant 0 : i32
    %c0_i32_0 = arith.constant 0 : i32
    %c0_i32_1 = arith.constant 0 : i32
    return %c0_i32, %c0_i32_0 : i32, i32
  }
  func.func @transform_7(%arg0: i32, %arg1: i32) -> (i32, i32) {
    %c0_i32 = arith.constant 0 : i32
    %c0_i32_0 = arith.constant 0 : i32
    %c0_i32_1 = arith.constant 0 : i32
    return %c0_i32, %c0_i32_0 : i32, i32
  }
  func.func @transform_8(%arg0: i32, %arg1: i32) -> (i32, i32) {
    %c0_i32 = arith.constant 0 : i32
    %c0_i32_0 = arith.constant 0 : i32
    %c0_i32_1 = arith.constant 0 : i32
    return %c0_i32, %c0_i32_0 : i32, i32
  }
  func.func @transform_9(%arg0: i32, %arg1: i32) -> (i32, i32, i32) {
    %c0_i32 = arith.constant 0 : i32
    %c0_i32_0 = arith.constant 0 : i32
    return %arg1, %arg0, %c0_i32 : i32, i32, i32
  }
}

</mosaic_0001>

<bundles_post_ra>
// kernel: tpu_custom_call.1
= control target key start
LH: loop header
LB: loop body
LE: loop exit
PB: predicated region body
PF: predicated region fallthrough
CT: control target
= control target key end

     0   :  { %14 = vsyncpa [#allocation5], 0  ;;  %s3671_s0 = inlined_call_operand.vmem [shape: f32[16,16], index: 0, kind: input, shape index: {}]   ;;  %s3672_s1 = inlined_call_operand.vmem [shape: f32[1,16,16], index: 1, kind: input, shape index: {}]   ;;  %s3673_s2 = inlined_call_operand.vmem [shape: f32[16,32], index: 2, kind: input, shape index: {}]   ;;  %s3674_s3 = inlined_call_operand.hbm [shape: f32[16,32], index: 3, kind: input, shape index: {}]   ;;  %s3675_s4 = inlined_call_operand.vmem [shape: f32[1,32], index: 4, kind: input, shape index: {}]   ;;  %s3676_s5 = inlined_call_operand.vmem [shape: f32[32,16], index: 5, kind: input, shape index: {}]   ;;  %s3677_s6 = inlined_call_operand.hbm [shape: f32[16,16], index: 6, kind: input, shape index: {}]   ;;  %s3678_s7 = inlined_call_operand.hbm [shape: f32[16,16], index: 7, kind: input, shape index: {}]   ;;  %s3679_s8 = inlined_call_operand.vmem [shape: f32[1,16], index: 8, kind: input, shape index: {}]   ;;  %s3680_s9 = inlined_call_operand.hbm [shape: f32[1,16,16], index: 9, kind: output, shape index: {}]  }
   0x1   :  { %15 = vsyncpa [#allocation8], 0 }
   0x2   :  { %16 = vsyncpa [#allocation6], 0  ;;  %s3372_s30 = smov [#allocation7]   ;;  %s3373_s11 = smov [#allocation4]  }
   0x3   :  { %s44_s10 = sshll.u32 %s3372_s30, 4  ;;  %s28_s12 = sshll.u32 %s3373_s11, 4  ;;  %s45_s10 = int_to_ptr.vmem [resolvable:$true] %s44_s10  ;;  %s3428_s12 = int_to_ptr.vmem [resolvable:$true] %s28_s12 }
   0x4   :  { %s3278_s15 = scalar_lea.hbm %s3677_s6, 256 }
   0x5   :  { %p3279_p0 = scmp.ne.s32.totalorder %s3677_s6, %s3278_s15  ;;  %p3282_p1 = scmp.lt.u32.totalorder %s3278_s15, %s3677_s6 }
   0x7   :  { %p3284_p2 = pnand %p3282_p1, %p3279_p0 }
   0x9   :  { %3287 = shalt.err (!%p3284_p2)
}
   0xa   :  { %s3288_s20 = scalar_lea.vmem %s45_s10, 256  ;;  %p3293_p4 = scmp.lt.s32.totalorder %s45_s10, %s45_s10 }
   0xb   :  { %p3289_p3 = scmp.ne.s32.totalorder %s45_s10, %s3288_s20  ;;  %p3294_p5 = scmp.lt.s32.totalorder %s3288_s20, %s3288_s20 }
   0xd   :  { %p3295_p6 = por %p3294_p5, %p3293_p4 }
   0xf   :  { %p3296_p7 = pnand %p3295_p6, %p3289_p3 }
  0x11   :  { %3299 = shalt.err (!%p3296_p7)
}
  0x12   :  { %s3374_s21 = smov 128   ;;  %s3375_s22 = smov 8  }
  0x13   :  { %50 = dma.hbm_to_vmem [thread:$0]  %s3677_s6, 256, %s45_s10, [#allocation8], %s3374_s21, %s3374_s21, %s3375_s22  }
  0x14   :  { %s3300_s27 = scalar_lea.hbm %s3674_s3, 256 }
  0x15   :  { %p3301_p8 = scmp.ne.s32.totalorder %s3674_s3, %s3300_s27  ;;  %p3304_p9 = scmp.lt.u32.totalorder %s3300_s27, %s3674_s3 }
  0x17   :  { %p3306_p10 = pnand %p3304_p9, %p3301_p8 }
  0x19   :  { %3309 = shalt.err (!%p3306_p10)
}
  0x1a   :  { %s3310_s13 = scalar_lea.vmem %s3428_s12, 256  ;;  %p3315_p12 = scmp.lt.s32.totalorder %s3428_s12, %s3428_s12 }
  0x1b   :  { %p3311_p11 = scmp.ne.s32.totalorder %s3428_s12, %s3310_s13  ;;  %p3316_p13 = scmp.lt.s32.totalorder %s3310_s13, %s3310_s13 }
  0x1d   :  { %p3317_p0 = por %p3316_p13, %p3315_p12 }
  0x1f   :  { %p3318_p1 = pnand %p3317_p0, %p3311_p11 }
  0x21   :  { %3321 = shalt.err (!%p3318_p1)
}
  0x22   :  { %34 = dma.hbm_to_vmem [thread:$0]  %s3674_s3, 256, %s3428_s12, [#allocation5], %s3374_s21, %s3374_s21, %s3375_s22  }
  0x23   :  { %s3376_s14 = smov [#allocation9]   ;;  %s3322_s18 = scalar_lea.hbm %s3678_s7, 256 }
  0x24   :  { %s56_s15 = sshll.u32 %s3376_s14, 4  ;;  %p3323_p2 = scmp.ne.s32.totalorder %s3678_s7, %s3322_s18  ;;  %s57_s15 = int_to_ptr.vmem [resolvable:$true] %s56_s15 }
  0x25   :  { %p3326_p3 = scmp.lt.u32.totalorder %s3322_s18, %s3678_s7 }
  0x27   :  { %p3328_p4 = pnand %p3326_p3, %p3323_p2 }
  0x29   :  { %3331 = shalt.err (!%p3328_p4)
}
  0x2a   :  { %s3332_s25 = scalar_lea.vmem %s57_s15, 256  ;;  %p3337_p6 = scmp.lt.s32.totalorder %s57_s15, %s57_s15 }
  0x2b   :  { %p3333_p5 = scmp.ne.s32.totalorder %s57_s15, %s3332_s25  ;;  %p3338_p7 = scmp.lt.s32.totalorder %s3332_s25, %s3332_s25 }
  0x2d   :  { %p3339_p8 = por %p3338_p7, %p3337_p6 }
  0x2f   :  { %p3340_p9 = pnand %p3339_p8, %p3333_p5 }
  0x31   :  { %3343 = shalt.err (!%p3340_p9)
}
  0x32   :  { %62 = dma.hbm_to_vmem [thread:$0]  %s3678_s7, 256, %s57_s15, [#allocation8], %s3374_s21, %s3374_s21, %s3375_s22  }
  0x33   :  { %3366 = dma.done.wait [#allocation5], 256  }
  0x34   :  { %3367 = vsyncadd [#allocation5], 4294967040 }
  0x35   :  { %3368 = dma.done.wait [#allocation8], 512  }
  0x36   :  { %3369 = vsyncadd [#allocation8], 4294966784  ;;  %vm89_vm0 = vcmask 130048   ;;  %v80_v0 = vld [vmem:[%s3673_s2] sm:$0xff]  ;;  %v81_v1 = vld [vmem:[%s3673_s2 + $0x8] sm:$0xff]  ;;  %vm598_vm1 = vcmask 261120  }
  0x37   :  { %v78_v2 = vld [vmem:[%s3671_s0] sm:$0xff]  ;;  %v97_v3 = vand.u32 4294901760, %v80_v0  ;;  %v100_v4 = vand.u32 4294901760, %v81_v1  ;;  %v79_v6 = vld [vmem:[%s3671_s0 + $0x8] sm:$0xff]  ;;  %v601_v25 = vld [vmem:[#allocation7] sm:$0xff] }
  0x38   :  { %v91_v5 = vsel %vm89_vm0, %v78_v2, 0  ;;  %v94_v8 = vsel %vm89_vm0, %v79_v6, 0  ;;  %v602_v27 = vld [vmem:[#allocation7 + $0x8] sm:$0xff]  ;;  %v611_v31 = vand.u32 4294901760, %v601_v25  ;;  %v1118_v45 = vld [vmem:[#allocation4] sm:$0xff]  ;;  %v1119_v46 = vld [vmem:[#allocation4 + $0x8] sm:$0xff] }
  0x39   :  { %v3493_v7 = vand.u32 4294901760, %v91_v5  ;;  %v3496_v9 = vpack.c.bf16 %v100_v4, %v97_v3  ;;  %v3498_v10 = vand.u32 4294901760, %v94_v8  ;;  %v185_v11 = vsub.f32 %v80_v0, %v97_v3  ;;  %v1114_v47 = vld [vmem:[%s3672_s1] sm:$0xff]  ;;  %v1115_v51 = vld [vmem:[%s3672_s1 + $0x8] sm:$0xff] }
  0x3a   :  { %v192_v12 = vsub.f32 %v81_v1, %v100_v4  ;;  %v614_v32 = vand.u32 4294901760, %v602_v27  ;;  %v699_v33 = vsub.f32 %v601_v25, %v611_v31  ;;  %v1128_v48 = vand.u32 4294901760, %v1118_v45 }
  0x3b   :  { %v3501_v13 = vsub.f32 %v91_v5, %v3493_v7  ;;  %3071 = vmatprep.subr.bf16.mxu0 %v3496_v9  ;;  %v3505_v14 = vsub.f32 %v94_v8, %v3498_v10  ;;  %v186_v15 = vand.u32 4294901760, %v185_v11  ;;  %v1131_v49 = vand.u32 4294901760, %v1119_v46 }
  0x3c   :  { %v193_v16 = vand.u32 4294901760, %v192_v12  ;;  %3073 = vmatpush3.bf16.msra.mxu0 %v3496_v9  ;;  %v3078_v30 = vpack.c.bf16 %v192_v12, %v185_v11  ;;  %v3519_v34 = vpack.c.bf16 %v614_v32, %v611_v31  ;;  %v706_v35 = vsub.f32 %v602_v27, %v614_v32 }
  0x3d   :  { %v3509_v17 = vand.u32 4294901760, %v3501_v13  ;;  %v3512_v18 = vand.u32 4294901760, %v3505_v14  ;;  %v187_v19 = vsub.f32 %v185_v11, %v186_v15  ;;  %v700_v36 = vand.u32 4294901760, %v699_v33 }
  0x3e   :  { %v194_v20 = vsub.f32 %v192_v12, %v193_v16  ;;  %3095 = vmatprep.subr.bf16.mxu1 %v3519_v34  ;;  %v707_v37 = vand.u32 4294901760, %v706_v35  ;;  %v3102_v43 = vpack.c.bf16 %v706_v35, %v699_v33  ;;  %v3086_v44 = vpack.c.bf16 %v193_v16, %v186_v15 }
  0x3f   :  { %v166_v21 = vsub.f32 %v3501_v13, %v3509_v17  ;;  %v176_v22 = vsub.f32 %v3505_v14, %v3512_v18  ;;  %v188_v23 = vand.u32 4294901760, %v187_v19  ;;  %3097 = vmatpush3.bf16.msra.mxu1 %v3519_v34  ;;  %v701_v38 = vsub.f32 %v699_v33, %v700_v36 }
  0x40   :  { %v195_v24 = vand.u32 4294901760, %v194_v20  ;;  %v708_v39 = vsub.f32 %v706_v35, %v707_v37  ;;  %v1122_v50 = vsel %vm89_vm0, %v1114_v47, 0  ;;  %v1125_v53 = vsel %vm89_vm0, %v1115_v51, 0 }
  0x41   :  { %v167_v26 = vand.u32 4294901760, %v166_v21  ;;  %v177_v28 = vand.u32 4294901760, %v176_v22  ;;  %v702_v40 = vand.u32 4294901760, %v701_v38  ;;  %v3540_v52 = vand.u32 4294901760, %v1122_v50 }
  0x42   :  { %v3074_v29 = vpack.c.bf16 %v195_v24, %v188_v23  ;;  %v709_v41 = vand.u32 4294901760, %v708_v39  ;;  %v1216_v54 = vsub.f32 %v1118_v45, %v1128_v48  ;;  %v1223_v55 = vsub.f32 %v1119_v46, %v1131_v49 }
  0x43   :  { %2840 = vmatprep.mubr.f32.mxu0 %v167_v26  ;;  %2882 = vmatprep.mubr.f32.mxu1 %v167_v26  ;;  %v3110_v56 = vpack.c.bf16 %v707_v37, %v700_v36  ;;  %v3544_v57 = vand.u32 4294901760, %v1125_v53  ;;  %v3549_v58 = vsub.f32 %v1122_v50, %v3540_v52  ;;  %v3118_v63 = vpack.c.bf16 %v1131_v49, %v1128_v48  ;;  %v2703_v49 = vld [vmem:[%s3679_s8] ss:$0 sm:$0xff] }
  0x44   :  { %2841 = vmatmul.mubr.f32.vlgmr.msra.gmra.mrb[0].mxu0 %v177_v28  ;;  %3075 = vmatprep.subr.bf16.mxu0 %v3074_v29  ;;  %v3098_v42 = vpack.c.bf16 %v709_v41, %v702_v40  ;;  %v1217_v59 = vand.u32 4294901760, %v1216_v54  ;;  %v1224_v60 = vand.u32 4294901760, %v1223_v55  ;;  %v3126_v12 = vpack.c.bf16 %v1223_v55, %v1216_v54 }
  0x45   :  { %3077 = vmatpush3.bf16.msra.mxu0 %v3074_v29  ;;  %2847 = vmatprep.mubr.f32.mxu0 %v3493_v7  ;;  %v3555_v61 = vsub.f32 %v1125_v53, %v3544_v57  ;;  %v3558_v62 = vand.u32 4294901760, %v3549_v58 }
  0x46   :  { %3079 = vmatprep.subr.bf16.mxu0 %v3078_v30  ;;  %2883 = vmatmul.mubr.f32.vlgmr.msra.gmra.mrb[0].mxu1 %v177_v28  ;;  %v1218_v0 = vsub.f32 %v1216_v54, %v1217_v59  ;;  %v1225_v1 = vsub.f32 %v1223_v55, %v1224_v60 }
  0x47   :  { %2889 = vmatprep.mubr.f32.mxu1 %v3493_v7  ;;  %3099 = vmatprep.subr.bf16.mxu1 %v3098_v42  ;;  %v3562_v2 = vand.u32 4294901760, %v3555_v61  ;;  %v1197_v3 = vsub.f32 %v3549_v58, %v3558_v62 }
  0x48   :  { %3101 = vmatpush3.bf16.msra.mxu1 %v3098_v42  ;;  %v1219_v4 = vand.u32 4294901760, %v1218_v0  ;;  %v1226_v5 = vand.u32 4294901760, %v1225_v1 }
  0x49   :  { %3103 = vmatprep.subr.bf16.mxu1 %v3102_v43  ;;  %v1207_v6 = vsub.f32 %v3555_v61, %v3562_v2  ;;  %v3573_v8 = vand.u32 4294901760, %v1197_v3 }
  0x4a   :  { %v3122_v11 = vpack.c.bf16 %v1226_v5, %v1219_v4 }
  0x4c   :  { %2848 = vmatmul.mubr.f32.vlgmr.msra.gmra.mrb[0].mxu0 %v3498_v10 }
  0x4d   :  { %3081 = vmatpush3.bf16.msra.mxu0 %v3078_v30  ;;  %2854 = vmatprep.mubr.f32.mxu0 %v3501_v13 }
  0x4e   :  { %3083 = vmatprep.subr.bf16.mxu0 %v3496_v9  ;;  %2890 = vmatmul.mubr.f32.vlgmr.msra.gmra.mrb[0].mxu1 %v3498_v10 }
  0x4f   :  { %3105 = vmatpush3.bf16.msra.mxu1 %v3102_v43  ;;  %2896 = vmatprep.mubr.f32.mxu1 %v3501_v13  ;;  %v3134_v13 = vpack.c.bf16 %v1224_v60, %v1217_v59 }
  0x50   :  { %3107 = vmatprep.subr.bf16.mxu1 %v3519_v34 }
  0x54   :  { %2855 = vmatmul.mubr.f32.vlgmr.msra.gmra.mrb[0].mxu0 %v3505_v14 }
  0x55   :  { %3085 = vmatpush3.bf16.msra.mxu0 %v3496_v9  ;;  %2861 = vmatprep.mubr.f32.mxu0 %v3509_v17 }
  0x56   :  { %3087 = vmatprep.subr.bf16.mxu0 %v3086_v44  ;;  %2897 = vmatmul.mubr.f32.vlgmr.msra.gmra.mrb[0].mxu1 %v3505_v14 }
  0x57   :  { %3109 = vmatpush3.bf16.msra.mxu1 %v3519_v34  ;;  %2903 = vmatprep.mubr.f32.mxu1 %v3509_v17  ;;  %v1635_v17 = vld [vmem:[%s3676_s5 + $0x10] sm:$0xff] }
  0x58   :  { %3111 = vmatprep.subr.bf16.mxu1 %v3110_v56  ;;  %v1653_v19 = vand.u32 4294901760, %v1635_v17 }
  0x5a   :  { %v1751_v29 = vsub.f32 %v1635_v17, %v1653_v19 }
  0x5c   :  { %2862 = vmatmul.mubr.f32.vlgmr.msra.gmra.mrb[0].mxu0 %v3512_v18  ;;  %v1752_v33 = vand.u32 4294901760, %v1751_v29 }
  0x5d   :  { %3089 = vmatpush3.bf16.msra.mxu0 %v3086_v44  ;;  %2868 = vmatprep.mubr.f32.mxu0 %v3493_v7  ;;  %v2702_v44 = vld [vmem:[%s3675_s4] ss:$0 sm:$0xff]  ;;  %s3377_s4 = smov [#allocation10]  }
  0x5e   :  { %3091 = vmatprep.subr.bf16.mxu0 %v3496_v9  ;;  %2904 = vmatmul.mubr.f32.vlgmr.msra.gmra.mrb[0].mxu1 %v3512_v18  ;;  %v1636_v18 = vld [vmem:[%s3676_s5 + $0x18] sm:$0xff]  ;;  %v1753_v37 = vsub.f32 %v1751_v29, %v1752_v33  ;;  %s2689_s8 = sshll.u32 %s3377_s4, 4  ;;  %s2690_s8 = int_to_ptr.vmem [resolvable:$true] %s2689_s8 }
  0x5f   :  { %3113 = vmatpush3.bf16.msra.mxu1 %v3110_v56  ;;  %2910 = vmatprep.mubr.f32.mxu1 %v3493_v7  ;;  %v1656_v20 = vand.u32 4294901760, %v1636_v18  ;;  %s3344_s3 = scalar_lea.vmem %s2690_s8, 256  ;;  %p3349_p11 = scmp.lt.s32.totalorder %s2690_s8, %s2690_s8 }
  0x60   :  { %3115 = vmatprep.subr.bf16.mxu1 %v3519_v34  ;;  %v1754_v39 = vand.u32 4294901760, %v1753_v37  ;;  %p3345_p10 = scmp.ne.s32.totalorder %s2690_s8, %s3344_s3  ;;  %p3350_p12 = scmp.lt.s32.totalorder %s3344_s3, %s3344_s3 }
  0x61   :  { %v3612_v21 = vpack.c.bf16 %v1656_v20, %v1653_v19  ;;  %v1758_v30 = vsub.f32 %v1636_v18, %v1656_v20 }
  0x62   :  { %p3351_p13 = por %p3350_p12, %p3349_p11 }
  0x63   :  { %v3620_v43 = vpack.c.bf16 %v1758_v30, %v1751_v29 }
  0x64   :  { %2869 = vmatmul.mubr.f32.vlgmr.msra.gmra.mrb[0].mxu0 %v3498_v10  ;;  %p3352_p0 = pnand %p3351_p13, %p3345_p10 }
  0x65   :  { %3093 = vmatpush3.bf16.msra.mxu0 %v3496_v9  ;;  %2875 = vmatprep.mubr.f32.mxu0 %v3493_v7  ;;  %v3576_v9 = vand.u32 4294901760, %v1207_v6 }
  0x66   :  { %3119 = vmatprep.subr.bf16.mxu0 %v3118_v63  ;;  %2911 = vmatmul.mubr.f32.vlgmr.msra.gmra.mrb[0].mxu1 %v3498_v10 }
  0x67   :  { %3117 = vmatpush3.bf16.msra.mxu1 %v3519_v34  ;;  %2917 = vmatprep.mubr.f32.mxu1 %v3493_v7  ;;  %v1633_v7 = vld [vmem:[%s3676_s5] sm:$0xff]  ;;  %v1759_v34 = vand.u32 4294901760, %v1758_v30 }
  0x68   :  { %v1647_v14 = vand.u32 4294901760, %v1633_v7 }
  0x69   :  { %v3178_v36 = vpack.c.bf16 %v1759_v34, %v1752_v33  ;;  %v1760_v38 = vsub.f32 %v1758_v30, %v1759_v34 }
  0x6a   :  { %v1737_v22 = vsub.f32 %v1633_v7, %v1647_v14 }
  0x6b   :  { %v1761_v40 = vand.u32 4294901760, %v1760_v38 }
  0x6c   :  { %2876 = vmatmul.mubr.f32.vlgmr.msra.gmra.mrb[0].mxu0 %v3498_v10  ;;  %v1738_v24 = vand.u32 4294901760, %v1737_v22 }
  0x6d   :  { %3121 = vmatpush3.bf16.msra.mxu0 %v3118_v63  ;;  %2924 = vmatprep.mubr.f32.mxu0 %v3573_v8  ;;  %v3154_v41 = vpack.c.bf16 %v1761_v40, %v1754_v39 }
  0x6e   :  { %3123 = vmatprep.subr.bf16.mxu0 %v3122_v11  ;;  %2918 = vmatmul.mubr.f32.vlgmr.msra.gmra.mrb[0].mxu1 %v3498_v10  ;;  %v1634_v10 = vld [vmem:[%s3676_s5 + $0x8] sm:$0xff]  ;;  %v1739_v27 = vsub.f32 %v1737_v22, %v1738_v24 }
  0x6f   :  { %v1650_v15 = vand.u32 4294901760, %v1634_v10 }
  0x70   :  { %2925 = vmatmul.mubr.f32.vlgmr.msra.gmra.mrb[2].mxu0 %v3576_v9  ;;  %v1740_v31 = vand.u32 4294901760, %v1739_v27 }
  0x71   :  { %3125 = vmatpush3.bf16.msra.mxu0 %v3122_v11  ;;  %2931 = vmatprep.mubr.f32.mxu0 %v3540_v52  ;;  %v3600_v16 = vpack.c.bf16 %v1650_v15, %v1647_v14  ;;  %v1744_v23 = vsub.f32 %v1634_v10, %v1650_v15  ;;  %v2174_v11 = vld [vmem:[#allocation9] sm:$0xff] }
  0x72   :  { %3127 = vmatprep.subr.bf16.mxu0 %v3126_v12  ;;  %v2177_v14 = vand.u32 4294901760, %v2174_v11 }
  0x73   :  { %3167 = vmatprep.subr.bf16.mxu1 %v3600_v16  ;;  %v1745_v25 = vand.u32 4294901760, %v1744_v23  ;;  %v3618_v42 = vpack.c.bf16 %v1744_v23, %v1737_v22 }
  0x74   :  { %3169 = vmatpush3.bf16.msra.mxu1 %v3600_v16  ;;  %v2265_v22 = vsub.f32 %v2174_v11, %v2177_v14 }
  0x75   :  { %3171 = vmatprep.subr.bf16.mxu1 %v3612_v21  ;;  %v3174_v26 = vpack.c.bf16 %v1745_v25, %v1738_v24  ;;  %v1746_v28 = vsub.f32 %v1744_v23, %v1745_v25 }
  0x76   :  { %v2266_v27 = vand.u32 4294901760, %v2265_v22 }
  0x77   :  { %v1747_v32 = vand.u32 4294901760, %v1746_v28 }
  0x78   :  { %2932 = vmatmul.mubr.f32.vlgmr.msra.gmra.mrb[2].mxu0 %v3544_v57  ;;  %3173 = vmatpush3.bf16.msra.mxu1 %v3612_v21  ;;  %v2267_v29 = vsub.f32 %v2265_v22, %v2266_v27 }
  0x79   :  { %3129 = vmatpush3.bf16.msra.mxu0 %v3126_v12  ;;  %2938 = vmatprep.mubr.f32.mxu0 %v3549_v58  ;;  %v3150_v35 = vpack.c.bf16 %v1747_v32, %v1740_v31  ;;  %v2175_v12 = vld [vmem:[#allocation9 + $0x8] sm:$0xff] }
  0x7a   :  { %3131 = vmatprep.subr.bf16.mxu0 %v3118_v63  ;;  %3175 = vmatprep.subr.bf16.mxu1 %v3174_v26  ;;  %v2180_v15 = vand.u32 4294901760, %v2175_v12  ;;  %v2268_v31 = vand.u32 4294901760, %v2267_v29 }
  0x7c   :  { %v2272_v23 = vsub.f32 %v2175_v12, %v2180_v15 }
  0x7e   :  { %v2273_v28 = vand.u32 4294901760, %v2272_v23 }
  0x80   :  { %2939 = vmatmul.mubr.f32.vlgmr.msra.gmra.mrb[2].mxu0 %v3555_v61  ;;  %v2274_v30 = vsub.f32 %v2272_v23, %v2273_v28 }
  0x81   :  { %3133 = vmatpush3.bf16.msra.mxu0 %v3118_v63  ;;  %2945 = vmatprep.mubr.f32.mxu0 %v3558_v62 }
  0x82   :  { %3135 = vmatprep.subr.bf16.mxu0 %v3134_v13  ;;  %v2275_v32 = vand.u32 4294901760, %v2274_v30 }
  0x84   :  { %v3194_v33 = vpack.c.bf16 %v2275_v32, %v2268_v31 }
  0x88   :  { %2946 = vmatmul.mubr.f32.vlgmr.msra.gmra.mrb[2].mxu0 %v3562_v2 }
  0x89   :  { %3137 = vmatpush3.bf16.msra.mxu0 %v3134_v13  ;;  %2952 = vmatprep.mubr.f32.mxu0 %v3540_v52 }
  0x8a   :  { %3139 = vmatprep.subr.bf16.mxu0 %v3118_v63 }
  0x90   :  { %2953 = vmatmul.mubr.f32.vlgmr.msra.gmra.mrb[2].mxu0 %v3544_v57 }
  0x91   :  { %3141 = vmatpush3.bf16.msra.mxu0 %v3118_v63  ;;  %2959 = vmatprep.mubr.f32.mxu0 %v3540_v52 }
  0x92   :  { %3143 = vmatprep.subr.bf16.mxu0 %v3600_v16 }
  0x98   :  { %2960 = vmatmul.mubr.f32.vlgmr.msra.gmra.mrb[2].mxu0 %v3544_v57 }
  0x99   :  { %3145 = vmatpush3.bf16.msra.mxu0 %v3600_v16 }
  0x9a   :  { %3147 = vmatprep.subr.bf16.mxu0 %v3612_v21 }
  0x9d   :  { %3149 = vmatpush3.bf16.msra.mxu0 %v3612_v21 }
  0x9e   :  { %3151 = vmatprep.subr.bf16.mxu0 %v3150_v35 }
 0x13f   :  { %v2877_v45 = vpop.f32.mrb[0].mxu0 }
 0x140   :  { %v3214_v46 = vadd.f32 %v2877_v45, %v2702_v44  ;;  %v588_v47 = vpop.f32.mrb[1].mxu0 }
 0x141   :  { %v3215_v48 = vadd.f32 %v2702_v44, %v588_v47  ;;  %v2919_v50 = vpop.f32.mrb[0].mxu1 }
 0x142   :  { %600 = vst.msk [vmem:[#allocation2 + $0x8] sm:$0xff] %vm598_vm1, %v3214_v46  ;;  %v3216_v51 = vadd.f32 %v2919_v50, %v2703_v49  ;;  %v1102_v53 = vpop.f32.mrb[1].mxu1 }
 0x143   :  { %599 = vst.msk [vmem:[#allocation2] sm:$0xff] %vm598_vm1, %v3215_v48  ;;  %v3217_v54 = vadd.f32 %v2703_v49, %v1102_v53 }
 0x144   :  { %1113 = vst.msk [vmem:[#allocation3 + $0x8] sm:$0xff] %vm89_vm0, %v3216_v51 }
 0x145   :  { %1112 = vst.msk [vmem:[#allocation3] sm:$0xff] %vm89_vm0, %v3217_v54 }
 0x149   :  { %v1117_v55 = vld [vmem:[#allocation2 + $0x8] sm:$0xff] }
 0x14a   :  { %v1116_v60 = vld [vmem:[#allocation2] sm:$0xff] }
 0x14c   :  { %v1637_v34 = vld [vmem:[#allocation3] sm:$0xff] }
 0x16b   :  { %v2961_v56 = vpop.f32.mrb[2].mxu0 }
 0x16c   :  { %v1630_v59 = vadd.f32 %v2961_v56, %v1117_v55  ;;  %v1619_v63 = vpop.f32.mrb[3].mxu0 }
 0x16d   :  { %v1629_v0 = vadd.f32 %v1619_v63, %v1116_v60 }
 0x16e   :  { %v1632_v1 = vmax.f32 %v1630_v59, 0.0 }
 0x16f   :  { %v1631_v3 = vmax.f32 %v1629_v0, 0.0 }
 0x170   :  { %v1644_v4 = vsel %vm598_vm1, %v1632_v1, 0 }
 0x171   :  { %v1725_v5 = vand.u32 4294901760, %v1644_v4  ;;  %v1641_v6 = vsel %vm598_vm1, %v1631_v3, 0 }
 0x172   :  { %v1715_v13 = vand.u32 4294901760, %v1641_v6 }
 0x173   :  { %v1726_v7 = vsub.f32 %v1644_v4, %v1725_v5 }
 0x174   :  { %v1716_v10 = vsub.f32 %v1641_v6, %v1715_v13 }
 0x175   :  { %v1727_v17 = vand.u32 4294901760, %v1726_v7 }
 0x176   :  { %v1717_v18 = vand.u32 4294901760, %v1716_v10 }
 0x177   :  { %v1728_v19 = vsub.f32 %v1726_v7, %v1727_v17 }
 0x178   :  { %3003 = vmatprep.mubr.f32.mxu1 %v1717_v18  ;;  %v1718_v20 = vsub.f32 %v1716_v10, %v1717_v18 }
 0x179   :  { %3004 = vmatmul.mubr.f32.vlgmr.msra.gmra.mrb[2].mxu1 %v1727_v17  ;;  %v1729_v25 = vand.u32 4294901760, %v1728_v19 }
 0x17a   :  { %3177 = vmatpush3.bf16.msra.mxu1 %v3174_v26  ;;  %3014 = vmatprep.mubr.f32.mxu1 %v1715_v13  ;;  %v1719_v24 = vand.u32 4294901760, %v1718_v20  ;;  %v3190_v26 = vpack.c.bf16 %v2180_v15, %v2177_v14 }
 0x17b   :  { %3179 = vmatprep.subr.bf16.mxu1 %v3178_v36 }
 0x17c   :  { %2970 = vmatprep.mubr.f32.mxu0 %v1719_v24 }
 0x17d   :  { %2971 = vmatmul.mubr.f32.vlgmr.msra.gmra.mrb[4].mxu0 %v1729_v25 }
 0x17e   :  { %3153 = vmatpush3.bf16.msra.mxu0 %v3150_v35  ;;  %2981 = vmatprep.mubr.f32.mxu0 %v1715_v13 }
 0x17f   :  { %3181 = vmatpush3.bf16.msra.mxu1 %v3178_v36  ;;  %3155 = vmatprep.subr.bf16.mxu0 %v3154_v41 }
 0x180   :  { %3183 = vmatprep.subr.bf16.mxu1 %v3600_v16 }
 0x182   :  { %3015 = vmatmul.mubr.f32.vlgmr.msra.gmra.mrb[2].mxu1 %v1725_v5  ;;  %3157 = vmatpush3.bf16.msra.mxu0 %v3154_v41 }
 0x183   :  { %3185 = vmatpush3.bf16.msra.mxu1 %v3600_v16  ;;  %3025 = vmatprep.mubr.f32.mxu1 %v1715_v13  ;;  %v3198_v16 = vpack.c.bf16 %v2272_v23, %v2265_v22 }
 0x184   :  { %3159 = vmatprep.subr.bf16.mxu0 %v3618_v42  ;;  %3187 = vmatprep.subr.bf16.mxu1 %v3612_v21 }
 0x185   :  { %2982 = vmatmul.mubr.f32.vlgmr.msra.gmra.mrb[4].mxu0 %v1725_v5 }
 0x186   :  { %3161 = vmatpush3.bf16.msra.mxu0 %v3618_v42  ;;  %2992 = vmatprep.mubr.f32.mxu0 %v1716_v10 }
 0x187   :  { %3189 = vmatpush3.bf16.msra.mxu1 %v3612_v21  ;;  %3163 = vmatprep.subr.bf16.mxu0 %v3620_v43  ;;  %v3206_v21 = vpack.c.bf16 %v2273_v28, %v2266_v27 }
 0x188   :  { %3191 = vmatprep.subr.bf16.mxu1 %v3190_v26 }
 0x18a   :  { %3026 = vmatmul.mubr.f32.vlgmr.msra.gmra.mrb[2].mxu1 %v1725_v5  ;;  %3165 = vmatpush3.bf16.msra.mxu0 %v3620_v43 }
 0x18b   :  { %3193 = vmatpush3.bf16.msra.mxu1 %v3190_v26  ;;  %3032 = vmatprep.mubr.f32.mxu1 %v3573_v8 }
 0x18c   :  { %3195 = vmatprep.subr.bf16.mxu1 %v3194_v33 }
 0x18d   :  { %2993 = vmatmul.mubr.f32.vlgmr.msra.gmra.mrb[4].mxu0 %v1726_v7 }
 0x192   :  { %3033 = vmatmul.mubr.f32.vlgmr.msra.gmra.mrb[2].mxu1 %v3576_v9 }
 0x193   :  { %3197 = vmatpush3.bf16.msra.mxu1 %v3194_v33  ;;  %3039 = vmatprep.mubr.f32.mxu1 %v3540_v52 }
 0x194   :  { %3199 = vmatprep.subr.bf16.mxu1 %v3198_v16 }
 0x19a   :  { %3040 = vmatmul.mubr.f32.vlgmr.msra.gmra.mrb[2].mxu1 %v3544_v57 }
 0x19b   :  { %3201 = vmatpush3.bf16.msra.mxu1 %v3198_v16  ;;  %3046 = vmatprep.mubr.f32.mxu1 %v3549_v58 }
 0x19c   :  { %3203 = vmatprep.subr.bf16.mxu1 %v3190_v26 }
 0x1a2   :  { %3047 = vmatmul.mubr.f32.vlgmr.msra.gmra.mrb[2].mxu1 %v3555_v61  ;;  %v1638_v61 = vld [vmem:[#allocation3 + $0x8] sm:$0xff] }
 0x1a3   :  { %3205 = vmatpush3.bf16.msra.mxu1 %v3190_v26  ;;  %3053 = vmatprep.mubr.f32.mxu1 %v3558_v62 }
 0x1a4   :  { %3207 = vmatprep.subr.bf16.mxu1 %v3206_v21 }
 0x1aa   :  { %3054 = vmatmul.mubr.f32.vlgmr.msra.gmra.mrb[2].mxu1 %v3562_v2 }
 0x1ab   :  { %3209 = vmatpush3.bf16.msra.mxu1 %v3206_v21  ;;  %3060 = vmatprep.mubr.f32.mxu1 %v3540_v52 }
 0x1ac   :  { %3211 = vmatprep.subr.bf16.mxu1 %v3190_v26 }
 0x1b2   :  { %3061 = vmatmul.mubr.f32.vlgmr.msra.gmra.mrb[2].mxu1 %v3544_v57 }
 0x1b3   :  { %3213 = vmatpush3.bf16.msra.mxu1 %v3190_v26  ;;  %3067 = vmatprep.mubr.f32.mxu1 %v3540_v52 }
 0x1ba   :  { %3068 = vmatmul.mubr.f32.vlgmr.msra.gmra.mrb[2].mxu1 %v3544_v57 }
 0x260   :  { %v2994_v58 = vpop.f32.mrb[4].mxu0 }
 0x261   :  { %v1908_v8 = vpop.f32.mrb[5].mxu0  ;;  %v3218_v9 = vadd.f32 %v2994_v58, %v1638_v61 }
 0x262   :  { %v3220_v62 = vadd.f32 %v1908_v8, %v1637_v34 }
 0x28d   :  { %v3069_v35 = vpop.f32.mrb[2].mxu1 }
 0x28e   :  { %v3219_v36 = vadd.f32 %v3218_v9, %v3069_v35  ;;  %v2668_v2 = vpop.f32.mrb[3].mxu1 }
 0x28f   :  { %v3221_v37 = vadd.f32 %v3220_v62, %v2668_v2 }
 0x290   :  { %v2681_v38 = vmax.f32 %v3219_v36, 0.0 }
 0x291   :  { %v2680_v39 = vmax.f32 %v3221_v37, 0.0 }
 0x292   :  { %2683 = vst.msk [vmem:[#allocation10 + $0x8] sm:$0xff] %vm89_vm0, %v2681_v38 }
 0x293   :  { %2682 = vst.msk [vmem:[#allocation10] sm:$0xff] %vm89_vm0, %v2680_v39 }
 0x294   :  { %3355 = shalt.err (!%p3352_p0)
}
 0x295   :  { %s3356_s27 = scalar_lea.hbm %s3680_s9, 256 }
 0x296   :  { %p3357_p1 = scmp.ne.s32.totalorder %s3680_s9, %s3356_s27  ;;  %p3360_p2 = scmp.lt.u32.totalorder %s3356_s27, %s3680_s9 }
 0x298   :  { %p3362_p3 = pnand %p3360_p2, %p3357_p1 }
 0x29a   :  { %3365 = shalt.err (!%p3362_p3)
}
 0x29b   :  { %2695 = dma.vmem_to_hbm [thread:$0]  %s2690_s8, 256, %s3680_s9, [#allocation6], %s3374_s21, %s3374_s21, %s3375_s22  }
 0x29c   :  { %3370 = dma.done.wait [#allocation6], 256  }
 0x29d   :  { %3371 = vsyncadd [#allocation6], 4294967040 }
 0x29e   :  { %2699 = vsyncpa [#allocation5], 1 }
 0x29f   :  { %2700 = vsyncpa [#allocation8], 1 }
 0x2a0   :  { %2701 = vsyncpa [#allocation6], 1 }

</bundles_post_ra>
